<compile_context>
chip_gen: v6e
topology: v6e:2x2x1
jax: 0.10.0
libtpu: 0.0.40
codegen_flags: <defaults>
</compile_context>

<pallas_src>
import functools
import math

import jax
import jax.numpy as jnp
from jax.experimental import pallas as pl
from jax.experimental.pallas import tpu as pltpu


# ----------------------------------------------------------------------------
# Helpers
# ----------------------------------------------------------------------------
def _round_up(x, m):
    return ((x + m - 1) // m) * m


def _vmem_limit_bytes():
    """~75% of per-core VMEM: ~48 MiB on v7x (64 MiB physical, headroom for
    double buffers / compiler scratch), ~96 MiB on v5e/v6e (128 MiB)."""
    try:
        cap = pltpu.get_tpu_info().vmem_capacity_bytes
        return min(int(cap * 3 // 4), 112 * 1024 * 1024)
    except Exception:
        return 48 * 1024 * 1024   # safe on every generation


def _seq_tile(s, target):
    """Largest tile <= target that divides s (multiple of 8 when possible)."""
    t = min(target, s)
    if s % t == 0:
        return t
    t = (t // 8) * 8
    while t >= 8:
        if s % t == 0:
            return t
        t -= 8
    return s   # odd small seq: single full block


# ----------------------------------------------------------------------------
# Tiled linear (GEMM + bias) kernel
# ----------------------------------------------------------------------------
_TM, _TN, _TK = 512, 512, 1024   # tile targets (review item: >=512 tiles)


def _matmul_bias_kernel(x_ref, w_ref, b_ref, o_ref, acc_ref):
    k = pl.program_id(2)

    @pl.when(k == 0)
    def _init():
        acc_ref[...] = jnp.zeros(acc_ref.shape, dtype=acc_ref.dtype)

    # Native-dtype operands straight into the MXU (bf16 inputs -> bf16 MXU
    # rate), f32 accumulation.
    acc_ref[...] += jnp.dot(x_ref[...], w_ref[...],
                            preferred_element_type=jnp.float32)

    @pl.when(k == pl.num_programs(2) - 1)
    def _finalize():
        out = acc_ref[...] + b_ref[...].astype(jnp.float32)
        o_ref[...] = out.astype(o_ref.dtype)


def matmul_bias(x, w, b):
    """x: (M, K); w: (K, N); b: (N,) -> (M, N), tiled + pipelined."""
    M, K = x.shape
    K2, N = w.shape
    assert K == K2 and b.shape == (N,)
    out_dtype = x.dtype

    def tile_and_pad(dim, target):
        if dim <= target:
            return dim, dim                      # single full block (always legal)
        return target, _round_up(dim, target)    # pad to a tile multiple

    tm, Mp = tile_and_pad(M, _TM)
    tn, Np = tile_and_pad(N, _TN)
    tk, Kp = tile_and_pad(K, _TK)

    # Pad (zeros) instead of silently falling back to full-dim blocks.
    if (Mp, Kp) != (M, K):
        x = jnp.pad(x, ((0, Mp - M), (0, Kp - K)))
    if (Kp, Np) != (K, N):
        w = jnp.pad(w, ((0, Kp - K), (0, Np - N)))
    b2 = b.reshape(1, N)
    if Np != N:
        b2 = jnp.pad(b2, ((0, 0), (0, Np - N)))

    grid = (Mp // tm, Np // tn, Kp // tk)
    out = pl.pallas_call(
        _matmul_bias_kernel,
        out_shape=jax.ShapeDtypeStruct((Mp, Np), out_dtype),
        grid=grid,
        in_specs=[
            pl.BlockSpec((tm, tk), lambda i, j, k: (i, k)),
            pl.BlockSpec((tk, tn), lambda i, j, k: (k, j)),
            pl.BlockSpec((1, tn), lambda i, j, k: (0, j)),
        ],
        out_specs=pl.BlockSpec((tm, tn), lambda i, j, k: (i, j)),
        scratch_shapes=[pltpu.VMEM((tm, tn), jnp.float32)],
        compiler_params=pltpu.CompilerParams(
            dimension_semantics=("parallel", "parallel", "arbitrary"),
            vmem_limit_bytes=_vmem_limit_bytes()),
    )(x, w, b2)
    if (Mp, Np) != (M, N):
        out = out[:M, :N]
    return out


# ----------------------------------------------------------------------------
# Flash-style GQA attention kernel (grouped per KV head)
# ----------------------------------------------------------------------------
_TQ, _TKV = 128, 128   # attention seq tile targets


def _gqa_flash_kernel(q_ref, k_ref, v_ref, o_ref,
                      qg_ref, m_ref, l_ref, acc_ref,
                      *, hkv, d, g, tq):
    # Blocks: q/o (1, tq, Hq*D); k/v (1, tkv, Hkv*D).
    # Scratch (per KV group): qg (g*tq, D) staged q, m/l (g*tq, 1) online
    # softmax stats, acc (g*tq, D) unnormalized output — all f32 except qg.
    kv_step = pl.program_id(2)

    @pl.when(kv_step == 0)
    def _init():
        m_ref[...] = jnp.full(m_ref.shape, -jnp.inf, dtype=jnp.float32)
        l_ref[...] = jnp.zeros(l_ref.shape, dtype=jnp.float32)
        acc_ref[...] = jnp.zeros(acc_ref.shape, dtype=jnp.float32)
        # Stage q once per q block into group-flattened (g*tq, D) rows so each
        # kv step runs ONE fat matmul per group instead of g skinny per-head
        # ones (amortized over all kv steps of this q block).  The 1/sqrt(D)
        # scale is already folded into W_q, so this is a pure copy.
        for grp in range(hkv):
            for j in range(g):
                h = grp * g + j
                qg_ref[grp, j * tq:(j + 1) * tq, :] = \
                    q_ref[0, :, h * d:(h + 1) * d]

    for grp in range(hkv):               # bounded loop: Hkv groups, not Hq heads
        k_h = k_ref[0, :, grp * d:(grp + 1) * d]     # (tkv, D)
        v_h = v_ref[0, :, grp * d:(grp + 1) * d]     # (tkv, D)
        q_g = qg_ref[grp]                            # (g*tq, D)

        # NT-form matmul (contract last dims) — no explicit k transpose.
        s = jax.lax.dot_general(q_g, k_h, (((1,), (1,)), ((), ())),
                                preferred_element_type=jnp.float32)  # (g*tq, tkv)

        m_prev = m_ref[grp]                                           # (g*tq, 1)
        m_new = jnp.maximum(m_prev, jnp.max(s, axis=-1, keepdims=True))
        alpha = jnp.exp(m_prev - m_new)
        p = jnp.exp(s - m_new)
        l_ref[grp] = alpha * l_ref[grp] + jnp.sum(p, axis=-1, keepdims=True)
        acc_ref[grp] = alpha * acc_ref[grp] + jnp.dot(
            p.astype(v_h.dtype), v_h, preferred_element_type=jnp.float32)
        m_ref[grp] = m_new

    @pl.when(kv_step == pl.num_programs(2) - 1)
    def _finalize():
        for grp in range(hkv):
            # Exact divide: once per q block, negligible cost, exact parity.
            out_g = acc_ref[grp] / l_ref[grp]                 # (g*tq, D) f32
            for j in range(g):
                h = grp * g + j
                # Heads live on the lane axis of the output -> contiguous
                # lane-slice stores (unmasked & dense when D % 128 == 0).
                o_ref[0, :, h * d:(h + 1) * d] = \
                    out_g[j * tq:(j + 1) * tq, :].astype(o_ref.dtype)


def gqa_flash_attention(qkv, batch, seq, hq, hkv, d):
    """qkv: (B*S, (Hq + 2*Hkv) * D) fused projection -> (B, S, Hq*D)."""
    g = hq // hkv
    ntot = (hq + 2 * hkv) * d
    qkv3 = qkv.reshape(batch, seq, ntot)

    if d % 128 == 0:
        # Read q/k/v as lane-aligned column windows of the fused GEMM output
        # directly via BlockSpec index maps — no HBM slice/copy round trip.
        q_in = k_in = v_in = qkv3
        k_col, v_col = g, g + 1        # block indices along the fused column axis
    else:
        # TODO(synk): unaligned head_dim (demo shapes): fall back to explicit
        # column slices — one extra HBM round trip of the QKV activations.
        q_in = qkv3[:, :, : hq * d]
        k_in = qkv3[:, :, hq * d:(hq + hkv) * d]
        v_in = qkv3[:, :, (hq + hkv) * d:]
        k_col = v_col = 0

    tq = _seq_tile(seq, _TQ)
    tkv = _seq_tile(seq, _TKV)
    gq = g * tq
    kernel = functools.partial(_gqa_flash_kernel, hkv=hkv, d=d, g=g, tq=tq)
    grid = (batch, seq // tq, seq // tkv)   # kv axis innermost ("arbitrary")

    return pl.pallas_call(
        kernel,
        out_shape=jax.ShapeDtypeStruct((batch, seq, hq * d), qkv.dtype),
        grid=grid,
        in_specs=[
            pl.BlockSpec((1, tq, hq * d), lambda b, qi, kv: (b, qi, 0)),
            pl.BlockSpec((1, tkv, hkv * d), lambda b, qi, kv: (b, kv, k_col)),
            pl.BlockSpec((1, tkv, hkv * d), lambda b, qi, kv: (b, kv, v_col)),
        ],
        out_specs=pl.BlockSpec((1, tq, hq * d), lambda b, qi, kv: (b, qi, 0)),
        scratch_shapes=[
            pltpu.VMEM((hkv, gq, d), qkv.dtype),       # staged group-flattened q
            pltpu.VMEM((hkv, gq, 1), jnp.float32),     # m (running max)
            pltpu.VMEM((hkv, gq, 1), jnp.float32),     # l (running denom)
            pltpu.VMEM((hkv, gq, d), jnp.float32),     # acc (unnormalized out)
        ],
        compiler_params=pltpu.CompilerParams(
            dimension_semantics=("parallel", "parallel", "arbitrary"),
            vmem_limit_bytes=_vmem_limit_bytes()),
    )(q_in, k_in, v_in)


# ----------------------------------------------------------------------------
# Module wrapper
# ----------------------------------------------------------------------------
def init_gqa_params(key, hidden_dim, nums_head, nums_kv_head, dtype=jnp.float32):
    head_dim = hidden_dim // nums_head

    def init_linear(k, fan_in, fan_out):
        kw, kb = jax.random.split(k)
        bound = 1.0 / math.sqrt(fan_in)
        w = jax.random.uniform(kw, (fan_in, fan_out), dtype, -bound, bound)
        b = jax.random.uniform(kb, (fan_out,), dtype, -bound, bound)
        return w, b

    kq, kk, kv, ko = jax.random.split(key, 4)
    return {
        "q": init_linear(kq, hidden_dim, nums_head * head_dim),
        "k": init_linear(kk, hidden_dim, nums_kv_head * head_dim),
        "v": init_linear(kv, hidden_dim, nums_kv_head * head_dim),
        "o": init_linear(ko, hidden_dim, hidden_dim),
    }


def prepare_gqa_params(params, hidden_dim, nums_head, nums_kv_head,
                       compute_dtype=None):
    """One-time parameter preparation (hoisted out of the forward pass):
      * fold 1/sqrt(head_dim) into the q projection,
      * fuse W_q|W_k|W_v (and biases) so QKV is a single GEMM,
      * optionally cast weights to bf16 for the bf16 MXU path (biases stay f32
        — they're added to the f32 accumulator)."""
    head_dim = hidden_dim // nums_head
    scale = 1.0 / math.sqrt(head_dim)
    wq, bq = params["q"]
    wk, bk = params["k"]
    wv, bv = params["v"]
    wo, bo = params["o"]
    w_qkv = jnp.concatenate([wq * scale, wk, wv], axis=1)
    b_qkv = jnp.concatenate([bq * scale, bk, bv], axis=0).astype(jnp.float32)
    if compute_dtype is not None:
        w_qkv = w_qkv.astype(compute_dtype)
        wo = wo.astype(compute_dtype)
    return {
        "w_qkv": w_qkv, "b_qkv": b_qkv,
        "w_o": wo, "b_o": bo.astype(jnp.float32),
        "nums_head": nums_head, "nums_kv_head": nums_kv_head,
        "head_dim": head_dim, "hidden_dim": hidden_dim,
        "compute_dtype": compute_dtype,
    }


def gqa_forward(prep, x):
    B, S, H = x.shape
    hq, hkv, d = prep["nums_head"], prep["nums_kv_head"], prep["head_dim"]
    if prep["compute_dtype"] is not None:
        x = x.astype(prep["compute_dtype"])

    x2d = x.reshape(B * S, H)
    # Fused QKV projection: activations are streamed from HBM once.
    qkv = matmul_bias(x2d, prep["w_qkv"], prep["b_qkv"])     # (B*S, (Hq+2Hkv)*D)
    # Flash-style grouped attention; output is (B, S, Hq*D) — no transposes.
    o = gqa_flash_attention(qkv, B, S, hq, hkv, d)
    out = matmul_bias(o.reshape(B * S, H), prep["w_o"], prep["b_o"])
    return out.reshape(B, S, H)


def gqa_reference(params, x, nums_head, nums_kv_head):
    """Pure-JAX reference mirroring the PyTorch forward (eval mode)."""
    B, S, H = x.shape
    head_dim = H // nums_head
    g = nums_head // nums_kv_head
    hp = jax.lax.Precision.HIGHEST
    Q = jnp.dot(x, params["q"][0], precision=hp) + params["q"][1]
    K = jnp.dot(x, params["k"][0], precision=hp) + params["k"][1]
    V = jnp.dot(x, params["v"][0], precision=hp) + params["v"][1]
    q = Q.reshape(B, S, nums_head, head_dim).transpose(0, 2, 1, 3)
    k = K.reshape(B, S, nums_kv_head, head_dim).transpose(0, 2, 1, 3)
    v = V.reshape(B, S, nums_kv_head, head_dim).transpose(0, 2, 1, 3)
    k_rep = jnp.repeat(k, g, axis=1)
    v_rep = jnp.repeat(v, g, axis=1)
    s = jnp.einsum("bhqd,bhkd->bhqk", q, k_rep, precision=hp) / math.sqrt(head_dim)
    p = jax.nn.softmax(s, axis=-1)
    o = jnp.einsum("bhqk,bhkd->bhqd", p, v_rep, precision=hp)
    o = o.transpose(0, 2, 1, 3).reshape(B, S, H)
    return jnp.dot(o, params["o"][0], precision=hp) + params["o"][1]


if __name__ == "__main__":
    # --- Config 1: generic GQA at tiny shapes (hidden=32, heads=4, kv=2),
    #     f32, tight parity check against the reference. -----------------------
    hidden_dim, nums_head, nums_kv_head = 32, 4, 2
    B, S = 2, 8
    key = jax.random.PRNGKey(0)
    kp, kx = jax.random.split(key)
    params = init_gqa_params(kp, hidden_dim, nums_head, nums_kv_head)
    x = jax.random.normal(kx, (B, S, hidden_dim), jnp.float32)

    prep = prepare_gqa_params(params, hidden_dim, nums_head, nums_kv_head)
    out = jax.block_until_ready(gqa_forward(prep, x))
    ref = gqa_reference(params, x, nums_head, nums_kv_head)
    assert out.shape == (B, S, hidden_dim)
    assert jnp.allclose(out, ref, atol=2e-3, rtol=2e-3), "f32 GQA mismatch vs reference"

    # --- Config 2: 128-aligned head_dim (hidden=512, heads=4, kv=2 -> D=128),
    #     bf16 MXU operands, multi-block online softmax, and the direct
    #     BlockSpec column windows into the fused QKV buffer. ------------------
    hidden_dim2, nums_head2, nums_kv_head2 = 512, 4, 2
    B2, S2 = 2, 256
    kp2, kx2 = jax.random.split(jax.random.PRNGKey(0))
    params2 = init_gqa_params(kp2, hidden_dim2, nums_head2, nums_kv_head2)
    x2 = jax.random.normal(kx2, (B2, S2, hidden_dim2), jnp.float32)

    # Quantize params / activations to bf16 once; reference runs in f32 from
    # the SAME quantized values so the comparison isolates kernel error.
    to_bf16 = lambda a: a.astype(jnp.bfloat16)
    to_f32 = lambda a: a.astype(jnp.float32)
    params2_q = jax.tree_util.tree_map(lambda a: to_f32(to_bf16(a)), params2)
    x2_q = to_bf16(x2)
    prep2 = prepare_gqa_params(params2_q, hidden_dim2, nums_head2, nums_kv_head2,
                               compute_dtype=jnp.bfloat16)
    out2 = jax.block_until_ready(gqa_forward(prep2, x2_q))
    ref2 = gqa_reference(params2_q, to_f32(x2_q), nums_head2, nums_kv_head2)
    assert out2.shape == (B2, S2, hidden_dim2)
    assert jnp.allclose(to_f32(out2), ref2, atol=1e-2, rtol=1e-2), \
        "bf16 GQA mismatch vs reference"

    print("KERNEL_OK")
</pallas_src>

<mosaic_0001>
module attributes {stable_mosaic.version = 11 : i64} {
  func.func @_matmul_bias_kernel(%arg0: i32, %arg1: i32, %arg2: i32, %arg3: memref<16x32xf32, #tpu.memory_space<vmem>>, %arg4: memref<32x64xf32, #tpu.memory_space<vmem>>, %arg5: memref<1x64xf32, #tpu.memory_space<vmem>>, %arg6: memref<16x64xf32, #tpu.memory_space<vmem>>, %arg7: memref<16x64xf32, #tpu.memory_space<vmem>>) attributes {dimension_semantics = [#tpu.dimension_semantics<parallel>, #tpu.dimension_semantics<parallel>, #tpu.dimension_semantics<arbitrary>], iteration_bounds = array<i64: 1, 1, 1>, scalar_prefetch = 0 : i64, scratch_operands = 1 : i64, tpu.core_type = #tpu.core_type<tc>, window_params = [{transform_indices = @transform_0, window_bounds = array<i64: 16, 32>}, {transform_indices = @transform_1, window_bounds = array<i64: 32, 64>}, {transform_indices = @transform_2, window_bounds = array<i64: 1, 64>}, {transform_indices = @transform_3, window_bounds = array<i64: 16, 64>}]} {
    %c0_i32 = arith.constant 0 : i32
    %0 = arith.cmpi eq, %arg2, %c0_i32 : i32
    %1 = arith.extui %0 : i1 to i32
    %c0_i32_0 = arith.constant 0 : i32
    %2 = arith.cmpi ne, %1, %c0_i32_0 : i32
    scf.if %2 {
      %cst_10 = arith.constant 0.000000e+00 : f32
      %12 = vector.broadcast %cst_10 : f32 to vector<16x64xf32>
      %c0_11 = arith.constant 0 : index
      %c0_12 = arith.constant 0 : index
      %13 = vector.load %arg7[%c0_11, %c0_12] : memref<16x64xf32, #tpu.memory_space<vmem>>, vector<16x64xf32>
      tpu.vector_store %arg7[%c0_11, %c0_12], %12 {strides = array<i32>} : memref<16x64xf32, #tpu.memory_space<vmem>>, vector<16x64xf32>,
    } else {
    }
    %c0 = arith.constant 0 : index
    %c0_1 = arith.constant 0 : index
    %3 = vector.load %arg7[%c0, %c0_1] : memref<16x64xf32, #tpu.memory_space<vmem>>, vector<16x64xf32>
    %c0_2 = arith.constant 0 : index
    %c0_3 = arith.constant 0 : index
    %4 = vector.load %arg3[%c0_2, %c0_3] : memref<16x32xf32, #tpu.memory_space<vmem>>, vector<16x32xf32>
    %c0_4 = arith.constant 0 : index
    %c0_5 = arith.constant 0 : index
    %5 = vector.load %arg4[%c0_4, %c0_5] : memref<32x64xf32, #tpu.memory_space<vmem>>, vector<32x64xf32>
    %cst = arith.constant dense<0.000000e+00> : vector<16x64xf32>
    %6 = tpu.matmul %4, %5, %cst {dimension_numbers = #tpu.dot_dimension_numbers<[1], [0], [0], [1], [0, 0, 1, 1], [], []>} : vector<16x32xf32>, vector<32x64xf32>, vector<16x64xf32> -> vector<16x64xf32>
    %7 = arith.addf %3, %6 : vector<16x64xf32>
    %c0_6 = arith.constant 0 : index
    %c0_7 = arith.constant 0 : index
    %8 = vector.load %arg7[%c0_6, %c0_7] : memref<16x64xf32, #tpu.memory_space<vmem>>, vector<16x64xf32>
    tpu.vector_store %arg7[%c0_6, %c0_7], %7 {strides = array<i32>} : memref<16x64xf32, #tpu.memory_space<vmem>>, vector<16x64xf32>,
    %c0_i32_8 = arith.constant 0 : i32
    %9 = arith.cmpi eq, %arg2, %c0_i32_8 : i32
    %10 = arith.extui %9 : i1 to i32
    %c0_i32_9 = arith.constant 0 : i32
    %11 = arith.cmpi ne, %10, %c0_i32_9 : i32
    scf.if %11 {
      %c0_10 = arith.constant 0 : index
      %c0_11 = arith.constant 0 : index
      %12 = vector.load %arg7[%c0_10, %c0_11] : memref<16x64xf32, #tpu.memory_space<vmem>>, vector<16x64xf32>
      %c0_12 = arith.constant 0 : index
      %c0_13 = arith.constant 0 : index
      %13 = vector.load %arg5[%c0_12, %c0_13] : memref<1x64xf32, #tpu.memory_space<vmem>>, vector<1x64xf32>
      %14 = vector.broadcast %13 : vector<1x64xf32> to vector<16x64xf32>
      %15 = arith.addf %12, %14 : vector<16x64xf32>
      %c0_14 = arith.constant 0 : index
      %c0_15 = arith.constant 0 : index
      %16 = vector.load %arg6[%c0_14, %c0_15] : memref<16x64xf32, #tpu.memory_space<vmem>>, vector<16x64xf32>
      tpu.vector_store %arg6[%c0_14, %c0_15], %15 {strides = array<i32>} : memref<16x64xf32, #tpu.memory_space<vmem>>, vector<16x64xf32>,
    } else {
    }
    return
  }
  func.func @transform_0(%arg0: i32, %arg1: i32, %arg2: i32) -> (i32, i32) {
    %c0_i32 = arith.constant 0 : i32
    return %arg0, %arg2 : i32, i32
  }
  func.func @transform_1(%arg0: i32, %arg1: i32, %arg2: i32) -> (i32, i32) {
    %c0_i32 = arith.constant 0 : i32
    return %arg2, %arg1 : i32, i32
  }
  func.func @transform_2(%arg0: i32, %arg1: i32, %arg2: i32) -> (i32, i32) {
    %c0_i32 = arith.constant 0 : i32
    %c0_i32_0 = arith.constant 0 : i32
    return %c0_i32, %arg1 : i32, i32
  }
  func.func @transform_3(%arg0: i32, %arg1: i32, %arg2: i32) -> (i32, i32) {
    %c0_i32 = arith.constant 0 : i32
    return %arg0, %arg1 : i32, i32
  }
}

</mosaic_0001>

<bundles_post_ra>
// kernel: tpu_custom_call.1
= control target key start
LH: loop header
LB: loop body
LE: loop exit
PB: predicated region body
PF: predicated region fallthrough
CT: control target
= control target key end

     0   :  { %8 = vsyncpa [#allocation4], 0  ;;  %s326_s0 = inlined_call_operand.hbm [shape: f32[16,32], index: 0, kind: input, shape index: {}]   ;;  %s327_s1 = inlined_call_operand.hbm [shape: f32[32,64], index: 1, kind: input, shape index: {}]   ;;  %s328_s2 = inlined_call_operand.vmem [shape: f32[1,64], index: 2, kind: input, shape index: {}]   ;;  %s329_s3 = inlined_call_operand.hbm [shape: f32[16,64], index: 3, kind: output, shape index: {}]  }
   0x1   :  { %9 = vsyncpa [#allocation7], 0 }
   0x2   :  { %10 = vsyncpa [#allocation5], 0  ;;  %s271_s12 = smov [#allocation3]  }
   0x3   :  { %s16_s13 = sshll.u32 %s271_s12, 4  ;;  %s17_s13 = int_to_ptr.vmem [resolvable:$true] %s16_s13 }
   0x4   :  { %s213_s14 = scalar_lea.vmem %s17_s13, 256  ;;  %p218_p1 = scmp.lt.s32.totalorder %s17_s13, %s17_s13 }
   0x5   :  { %p214_p0 = scmp.ne.s32.totalorder %s17_s13, %s213_s14  ;;  %p219_p2 = scmp.lt.s32.totalorder %s213_s14, %s213_s14 }
   0x7   :  { %p220_p3 = por %p219_p2, %p218_p1 }
   0x9   :  { %p221_p4 = pnand %p220_p3, %p214_p0 }
   0xb   :  { %224 = shalt.err (!%p221_p4)
}
   0xc   :  { %s272_s15 = smov 128   ;;  %s273_s16 = smov 8  }
   0xd   :  { %22 = dma.hbm_to_vmem [thread:$0]  %s326_s0, 256, %s17_s13, [#allocation4], %s272_s15, %s272_s15, %s273_s16  }
   0xe   :  { %s274_s19 = smov [#allocation6]  }
   0xf   :  { %s28_s20 = sshll.u32 %s274_s19, 4  ;;  %s29_s20 = int_to_ptr.vmem [resolvable:$true] %s28_s20 }
  0x10   :  { %s233_s21 = scalar_lea.vmem %s29_s20, 512  ;;  %p238_p6 = scmp.lt.s32.totalorder %s29_s20, %s29_s20 }
  0x11   :  { %p234_p5 = scmp.ne.s32.totalorder %s29_s20, %s233_s21  ;;  %p239_p7 = scmp.lt.s32.totalorder %s233_s21, %s233_s21 }
  0x13   :  { %p240_p8 = por %p239_p7, %p238_p6 }
  0x15   :  { %p241_p9 = pnand %p240_p8, %p234_p5 }
  0x17   :  { %244 = shalt.err (!%p241_p9)
}
  0x18   :  { %34 = dma.hbm_to_vmem [thread:$0]  %s327_s1, 512, %s29_s20, [#allocation7], %s272_s15, %s272_s15, %s273_s16  }
  0x19   :  { %265 = dma.done.wait [#allocation4], 256  }
  0x1a   :  { %266 = vsyncadd [#allocation4], 4294967040 }
  0x1b   :  { %267 = dma.done.wait [#allocation7], 512  }
  0x1c   :  { %268 = vsyncadd [#allocation7], 4294966784  ;;  %vm47_vm0 = vcmask 523264   ;;  %v275_v0 = vmov 0.0   ;;  %vm58_vm1 = vcmask 261120   ;;  %v57_v1 = vld [vmem:[#allocation6 + $0x18] sm:$0xff] }
  0x1d   :  { %49 = vst.msk [vmem:[#allocation2 + $0x8] sm:$0xff] %vm47_vm0, %v275_v0  ;;  %48 = vst.msk [vmem:[#allocation2] sm:$0xff] %vm47_vm0, %v275_v0  ;;  %v56_v2 = vld [vmem:[#allocation6 + $0x10] sm:$0xff]  ;;  %188 = vmatprep.subr.mxu0 %v57_v1  ;;  %v55_v4 = vld [vmem:[#allocation6 + $0x8] sm:$0xff]  ;;  %s276_s24 = smov [#allocation8]  }
  0x1e   :  { %v52_v3 = vld [vmem:[#allocation3] sm:$0xff]  ;;  %189 = vmatpush3.msra.mxu0 %v57_v1  ;;  %v54_v5 = vld [vmem:[#allocation6] sm:$0xff]  ;;  %v53_v6 = vld [vmem:[#allocation3 + $0x8] sm:$0xff]  ;;  %s166_s25 = sshll.u32 %s276_s24, 4  ;;  %s167_s25 = int_to_ptr.vmem [resolvable:$true] %s166_s25 }
  0x1f   :  { %196 = vmatprep.mubr.msk.f32.mxu0 %vm58_vm1, %v52_v3  ;;  %190 = vmatprep.subr.mxu0 %v56_v2  ;;  %v181_v13 = vld [vmem:[%s328_s2] ss:$0 sm:$0xff]  ;;  %s245_s26 = scalar_lea.vmem %s167_s25, 256  ;;  %p250_p11 = scmp.lt.s32.totalorder %s167_s25, %s167_s25 }
  0x20   :  { %191 = vmatpush3.msra.mxu0 %v56_v2  ;;  %p246_p10 = scmp.ne.s32.totalorder %s167_s25, %s245_s26  ;;  %p251_p12 = scmp.lt.s32.totalorder %s245_s26, %s245_s26 }
  0x21   :  { %192 = vmatprep.subr.mxu0 %v55_v4 }
  0x22   :  { %193 = vmatpush3.msra.mxu0 %v55_v4  ;;  %p252_p13 = por %p251_p12, %p250_p11 }
  0x23   :  { %194 = vmatprep.subr.mxu0 %v54_v5 }
  0x24   :  { %195 = vmatpush3.msra.mxu0 %v54_v5  ;;  %v51_v7 = vld [vmem:[#allocation2 + $0x8] sm:$0xff]  ;;  %v50_v9 = vld [vmem:[#allocation2] sm:$0xff]  ;;  %p253_p0 = pnand %p252_p13, %p246_p10 }
  0x25   :  { %197 = vmatmul.mubr.msk.f32.vlgmr.msra.gmra.mxu0 %vm58_vm1, %v53_v6 }
  0xe5   :  { %v198_v8 = vpop.f32.mrf.mxu0 }
  0xe6   :  { %v141_v10 = vadd.f32 %v198_v8, %v51_v7 }
  0xe7   :  { %v131_v11 = vpop.f32.mrf.mxu0 }
  0xe8   :  { %144 = vst.msk [vmem:[#allocation2 + $0x8] sm:$0xff] %vm47_vm0, %v141_v10  ;;  %v140_v12 = vadd.f32 %v131_v11, %v50_v9 }
  0xea   :  { %143 = vst.msk [vmem:[#allocation2] sm:$0xff] %vm47_vm0, %v140_v12 }
  0xef   :  { %v149_v14 = vld [vmem:[#allocation2 + $0x8] sm:$0xff] }
  0xf0   :  { %v158_v15 = vadd.f32 %v181_v13, %v149_v14 }
  0xf1   :  { %v148_v16 = vld [vmem:[#allocation2] sm:$0xff] }
  0xf2   :  { %v157_v17 = vadd.f32 %v181_v13, %v148_v16  ;;  %160 = vst.msk [vmem:[#allocation8 + $0x8] sm:$0xff] %vm47_vm0, %v158_v15 }
  0xf4   :  { %159 = vst.msk [vmem:[#allocation8] sm:$0xff] %vm47_vm0, %v157_v17 }
  0xf5   :  { %256 = shalt.err (!%p253_p0)
}
  0xf6   :  { %172 = dma.vmem_to_hbm [thread:$0]  %s167_s25, 256, %s329_s3, [#allocation5], %s272_s15, %s272_s15, %s273_s16  }
  0xf7   :  { %269 = dma.done.wait [#allocation5], 256  }
  0xf8   :  { %270 = vsyncadd [#allocation5], 4294967040 }
  0xf9   :  { %176 = vsyncpa [#allocation4], 1 }
  0xfa   :  { %177 = vsyncpa [#allocation7], 1 }
  0xfb   :  { %178 = vsyncpa [#allocation5], 1 }

</bundles_post_ra>
